<compile_context>
chip_gen: v6e
topology: v6e:2x2x1
jax: 0.10.0
libtpu: 0.0.40
codegen_flags: <defaults>
</compile_context>

<pallas_src>
import math

import numpy as np
import jax
import jax.numpy as jnp
from jax.experimental import pallas as pl
from jax.experimental.pallas import tpu as pltpu


def _make_bezier_kernel(eps: float, cp_are_logits: bool):
    def kernel(cp_ref, basis_ref, out_ref):
        cp = cp_ref[...].astype(jnp.float32)                       # (bt, K)
        if cp_are_logits:
            # p = tanh(x) * (1 - eps);  p = p * 0.5 + 0.5   (EUP tanh + VPU fma)
            cp = jnp.tanh(cp) * ((1.0 - eps) * 0.5) + 0.5
        # Single MXU contraction: (bt, K) @ (K, F_pad) -> (bt, F_pad)
        out_ref[...] = jnp.dot(cp, basis_ref[...],
                               preferred_element_type=jnp.float32)
    return kernel


class PiecewiseBezierPallas:
    """JAX/Pallas port of acid_ddsp.curves.PiecewiseBezier (forward pass only)."""

    _MAX_BT = 256                     # batch-tile cap (rows)
    _VMEM_BUDGET = 16 * 1024 * 1024   # conservative: fits default scoped VMEM on all gens

    def __init__(self, n_frames, n_segments, degree, modes=None, is_c1_cont=False, eps=1e-3):
        assert n_frames >= 2
        assert n_segments >= 1
        assert n_segments < n_frames
        assert degree >= 1
        if is_c1_cont:
            assert degree >= 3
        self.n_frames = n_frames
        self.n_segments = n_segments
        self.degree = degree
        self.is_c1_cont = is_c1_cont
        self.eps = eps

        if modes is None:
            modes = jnp.linspace(0.0, 1.0, n_segments + 1)[1:-1].reshape(1, -1)
        support, mask = self._create_support_and_mask(modes)
        self.support = support[0].astype(jnp.float32)    # (S, F)
        self.mask = mask[0].astype(jnp.float32)          # (S, F)

        # ---- precompute masked Bernstein basis (and fold in the C1 map) ----
        d = degree
        k = n_segments * (d + 1)
        self.k = k
        t = self.support                                           # (S, F)
        basis = jnp.stack(
            [math.comb(d, i) * (t ** i) * ((1.0 - t) ** (d - i)) for i in range(d + 1)],
            axis=1,
        )                                                          # (S, D+1, F)
        basis = basis * self.mask[:, None, :]
        basis = basis.reshape(k, n_frames)                         # (K, F)

        if is_c1_cont:
            # cp_new = cp_flat @ M  <=>  cp[:, s, 1] = 2*cp[:, s-1, D] - cp[:, s-1, D-1], s>=1
            m = np.eye(k, dtype=np.float32)
            for s in range(1, n_segments):
                jt = s * (d + 1) + 1
                m[jt, jt] = 0.0
                m[(s - 1) * (d + 1) + d, jt] = 2.0
                m[(s - 1) * (d + 1) + d - 1, jt] = -1.0
            basis = jnp.asarray(m) @ basis                         # fold: cp @ (M @ basis)

        # lane-dense: pad frames to a multiple of 128 (pad columns are zero -> sliced off)
        self.f_pad = ((n_frames + 127) // 128) * 128
        if self.f_pad != n_frames:
            basis = jnp.pad(basis, ((0, 0), (0, self.f_pad - n_frames)))
        self.basis_eff = basis.astype(jnp.float32)                 # (K, F_pad)

    def _create_support_and_mask(self, modes):
        assert modes.ndim == 2 and modes.shape[1] == self.n_segments - 1
        bs = modes.shape[0]
        support = jnp.linspace(0.0, 1.0, self.n_frames).reshape(1, 1, -1)
        support = jnp.tile(support, (bs, self.n_segments, 1))
        seg_starts = jnp.pad(modes, ((0, 0), (1, 0)))[:, :, None]  # (bs, S, 1)
        seg_ends = jnp.roll(seg_starts, shift=-1, axis=1)
        seg_ends = seg_ends.at[:, -1, :].set(1.0)
        seg_ranges = seg_ends - seg_starts
        mask = (support >= seg_starts) & (support < seg_ends)
        mask = mask.at[:, -1, -1].set(True)
        support = (support - seg_starts) / seg_ranges
        support = support * mask
        return support, mask

    def _pick_bt(self, b, cp_itemsize):
        # double-buffered cp tile + double-buffered out tile + double-buffered basis
        fixed = 2 * self.k * self.f_pad * 4
        per_row = 2 * (self.k * cp_itemsize + self.f_pad * 4)
        bt_cap = max(8, (self._VMEM_BUDGET - fixed) // per_row)
        b_up = ((b + 7) // 8) * 8
        bt = min(self._MAX_BT, bt_cap, b_up)
        bt = max(8, (bt // 8) * 8)
        return int(bt)

    def __call__(self, cp, cp_are_logits=False, si_logits=None):
        n_dim = cp.ndim
        if n_dim == 4:
            bs, n_ch = cp.shape[0], cp.shape[1]
            cp = cp.reshape(bs * n_ch, cp.shape[2], cp.shape[3])
        assert cp.ndim == 3
        assert cp.shape[1] == self.n_segments
        assert cp.shape[2] == self.degree + 1
        # TODO(synk): si_logits only feeds assertions in the reference (the mask ignores it),
        # so it has no effect on the output and is not consumed here.

        b = cp.shape[0]
        cp_flat = cp.reshape(b, self.k)                 # native dtype, no wrapper upcast

        bt = self._pick_bt(b, jnp.dtype(cp_flat.dtype).itemsize)
        n_blocks = pl.cdiv(b, bt)
        b_pad = n_blocks * bt
        if b_pad != b:
            cp_flat = jnp.pad(cp_flat, ((0, b_pad - b), (0, 0)))

        kernel = _make_bezier_kernel(self.eps, bool(cp_are_logits))
        k, f_pad = self.k, self.f_pad

        out = pl.pallas_call(
            kernel,
            out_shape=jax.ShapeDtypeStruct((b_pad, f_pad), jnp.float32),
            grid=(n_blocks,),
            in_specs=[
                pl.BlockSpec((bt, k), lambda i: (i, 0)),
                pl.BlockSpec((k, f_pad), lambda i: (0, 0)),
            ],
            out_specs=pl.BlockSpec((bt, f_pad), lambda i: (i, 0)),
            compiler_params=pltpu.CompilerParams(
                dimension_semantics=("parallel",)),
        )(cp_flat, self.basis_eff)

        out = out[:b, :self.n_frames]
        if n_dim == 4:
            out = out.reshape(bs, n_ch, self.n_frames)
        return out


def _ref_forward(module, cp, cp_are_logits=False):
    """Pure-JAX reference mirroring the PyTorch semantics (including C1 continuity)."""
    n_dim = cp.ndim
    if n_dim == 4:
        bs, n_ch = cp.shape[0], cp.shape[1]
        cp = cp.reshape(bs * n_ch, cp.shape[2], cp.shape[3])
    cp = cp.astype(jnp.float32)
    if cp_are_logits:
        cp = jnp.tanh(cp) * (1.0 - module.eps) * 0.5 + 0.5
    if module.is_c1_cont:
        q1 = 2.0 * cp[:, :-1, -1] - cp[:, :-1, -2]
        cp = cp.at[:, 1:, 1].set(q1)
    d = module.degree
    t = module.support                                      # (S, F)
    basis = jnp.stack(
        [math.comb(d, i) * (t ** i) * ((1.0 - t) ** (d - i)) for i in range(d + 1)],
        axis=-1,
    )                                                        # (S, F, D+1)
    bez = jnp.einsum("bsi,sfi->bsf", cp, basis)
    bez = bez * module.mask[None]
    out = bez.sum(axis=1)
    if n_dim == 4:
        out = out.reshape(bs, n_ch, module.n_frames)
    return out


if __name__ == "__main__":
    key = jax.random.PRNGKey(0)
    n_frames, n_segments, degree = 16, 4, 3

    # case 1: 4D input, logits path, no C1 continuity
    bs, n_ch = 2, 4
    mod_a = PiecewiseBezierPallas(n_frames, n_segments, degree)
    cp_a = jax.random.normal(key, (bs, n_ch, n_segments, degree + 1), dtype=jnp.float32)
    out_a = jax.block_until_ready(mod_a(cp_a, cp_are_logits=True))
    assert out_a.shape == (bs, n_ch, n_frames), out_a.shape
    ref_a = _ref_forward(mod_a, cp_a, cp_are_logits=True)
    assert jnp.allclose(out_a, ref_a, atol=1e-5, rtol=1e-5), float(jnp.max(jnp.abs(out_a - ref_a)))

    # case 2: 3D input with batch not a multiple of 8, raw control points, C1 continuity
    mod_b = PiecewiseBezierPallas(n_frames, n_segments, degree, is_c1_cont=True)
    key2 = jax.random.PRNGKey(1)
    cp_b = jax.random.uniform(key2, (6, n_segments, degree + 1), dtype=jnp.float32)
    out_b = jax.block_until_ready(mod_b(cp_b, cp_are_logits=False))
    assert out_b.shape == (6, n_frames), out_b.shape
    ref_b = _ref_forward(mod_b, cp_b, cp_are_logits=False)
    assert jnp.allclose(out_b, ref_b, atol=1e-5, rtol=1e-5), float(jnp.max(jnp.abs(out_b - ref_b)))

    print("KERNEL_OK")
</pallas_src>

<mosaic_0001>
module attributes {stable_mosaic.version = 11 : i64} {
  func.func @kernel(%arg0: i32, %arg1: memref<8x16xf32, #tpu.memory_space<vmem>>, %arg2: memref<16x128xf32, #tpu.memory_space<vmem>>, %arg3: memref<8x128xf32, #tpu.memory_space<vmem>>) attributes {dimension_semantics = [#tpu.dimension_semantics<parallel>], iteration_bounds = array<i64: 1>, scalar_prefetch = 0 : i64, scratch_operands = 0 : i64, tpu.core_type = #tpu.core_type<tc>, window_params = [{transform_indices = @transform_0, window_bounds = array<i64: 8, 16>}, {pipeline_mode = #tpu.pipeline_mode<synchronous>, transform_indices = @transform_1, window_bounds = array<i64: 16, 128>}, {transform_indices = @transform_2, window_bounds = array<i64: 8, 128>}]} {
    %c0 = arith.constant 0 : index
    %c0_0 = arith.constant 0 : index
    %0 = vector.load %arg1[%c0, %c0_0] : memref<8x16xf32, #tpu.memory_space<vmem>>, vector<8x16xf32>
    %1 = math.tanh %0 : vector<8x16xf32>
    %cst = arith.constant 4.995000e-01 : f32
    %2 = vector.broadcast %cst : f32 to vector<8x16xf32>
    %3 = arith.mulf %1, %2 : vector<8x16xf32>
    %cst_1 = arith.constant 5.000000e-01 : f32
    %4 = vector.broadcast %cst_1 : f32 to vector<8x16xf32>
    %5 = arith.addf %3, %4 : vector<8x16xf32>
    %c0_2 = arith.constant 0 : index
    %c0_3 = arith.constant 0 : index
    %6 = vector.load %arg2[%c0_2, %c0_3] : memref<16x128xf32, #tpu.memory_space<vmem>>, vector<16x128xf32>
    %cst_4 = arith.constant dense<0.000000e+00> : vector<8x128xf32>
    %7 = tpu.matmul %5, %6, %cst_4 {dimension_numbers = #tpu.dot_dimension_numbers<[1], [0], [0], [1], [0, 0, 1, 1], [], []>} : vector<8x16xf32>, vector<16x128xf32>, vector<8x128xf32> -> vector<8x128xf32>
    %c0_5 = arith.constant 0 : index
    %c0_6 = arith.constant 0 : index
    %8 = vector.load %arg3[%c0_5, %c0_6] : memref<8x128xf32, #tpu.memory_space<vmem>>, vector<8x128xf32>
    tpu.vector_store %arg3[%c0_5, %c0_6], %7 {strides = array<i32>} : memref<8x128xf32, #tpu.memory_space<vmem>>, vector<8x128xf32>,
    return
  }
  func.func @transform_0(%arg0: i32) -> (i32, i32) {
    %c0_i32 = arith.constant 0 : i32
    %c0_i32_0 = arith.constant 0 : i32
    return %arg0, %c0_i32 : i32, i32
  }
  func.func @transform_1(%arg0: i32) -> (i32, i32) {
    %c0_i32 = arith.constant 0 : i32
    %c0_i32_0 = arith.constant 0 : i32
    %c0_i32_1 = arith.constant 0 : i32
    return %c0_i32, %c0_i32_0 : i32, i32
  }
  func.func @transform_2(%arg0: i32) -> (i32, i32) {
    %c0_i32 = arith.constant 0 : i32
    %c0_i32_0 = arith.constant 0 : i32
    return %arg0, %c0_i32 : i32, i32
  }
}

</mosaic_0001>

<bundles_post_ra>
// kernel: tpu_custom_call.1
= control target key start
LH: loop header
LB: loop body
LE: loop exit
PB: predicated region body
PF: predicated region fallthrough
CT: control target
= control target key end

     0   :  { %7 = vsyncpa [#allocation3], 0  ;;  %s252_s0 = inlined_call_operand.hbm [shape: f32[8,16], index: 0, kind: input, shape index: {}]   ;;  %s253_s1 = inlined_call_operand.hbm [shape: f32[16,128], index: 1, kind: input, shape index: {}]   ;;  %s254_s2 = inlined_call_operand.hbm [shape: f32[8,128], index: 2, kind: output, shape index: {}]  }
   0x1   :  { %8 = vsyncpa [#allocation6], 0 }
   0x2   :  { %9 = vsyncpa [#allocation4], 0  ;;  %s221_s9 = smov [#allocation2]   ;;  %s222_s11 = smov [#allocation5]  }
   0x3   :  { %s16_s10 = sshll.u32 %s221_s9, 4  ;;  %s25_s12 = sshll.u32 %s222_s11, 4  ;;  %s17_s10 = int_to_ptr.vmem [resolvable:$true] %s16_s10  ;;  %s26_s12 = int_to_ptr.vmem [resolvable:$true] %s25_s12 }
   0x4   :  { %s163_s13 = scalar_lea.vmem %s17_s10, 128  ;;  %p168_p1 = scmp.lt.s32.totalorder %s17_s10, %s17_s10 }
   0x5   :  { %p164_p0 = scmp.ne.s32.totalorder %s17_s10, %s163_s13  ;;  %p169_p2 = scmp.lt.s32.totalorder %s163_s13, %s163_s13 }
   0x7   :  { %p170_p3 = por %p169_p2, %p168_p1 }
   0x9   :  { %p171_p4 = pnand %p170_p3, %p164_p0 }
   0xb   :  { %174 = shalt.err (!%p171_p4)
}
   0xc   :  { %19 = dma.hbm_to_vmem [thread:$0]  %s252_s0, 128, %s17_s10, [#allocation3]  }
   0xd   :  { %s183_s16 = scalar_lea.vmem %s26_s12, 256  ;;  %p188_p6 = scmp.lt.s32.totalorder %s26_s12, %s26_s12 }
   0xe   :  { %p184_p5 = scmp.ne.s32.totalorder %s26_s12, %s183_s16  ;;  %p189_p7 = scmp.lt.s32.totalorder %s183_s16, %s183_s16 }
  0x10   :  { %p190_p8 = por %p189_p7, %p188_p6 }
  0x12   :  { %p191_p9 = pnand %p190_p8, %p184_p5 }
  0x14   :  { %194 = shalt.err (!%p191_p9)
}
  0x15   :  { %s223_s17 = smov 128   ;;  %s224_s18 = smov 8  }
  0x16   :  { %31 = dma.hbm_to_vmem [thread:$0]  %s253_s1, 256, %s26_s12, [#allocation6], %s223_s17, %s223_s17, %s224_s18  }
  0x17   :  { %215 = dma.done.wait [#allocation3], 128  }
  0x18   :  { %216 = vsyncadd [#allocation3], 4294967168 }
  0x19   :  { %217 = dma.done.wait [#allocation6], 256  }
  0x1a   :  { %218 = vsyncadd [#allocation6], 4294967040  ;;  %v225_v0 = vmov 0.0   ;;  %vm226_vm0 = vmmov 0   ;;  %v43_v1 = vld [vmem:[#allocation5 + $0x8] sm:$0xff]  ;;  %v42_v2 = vld [vmem:[#allocation5] sm:$0xff] }
  0x1b   :  { %139 = vmatprep.subr.mxu0 %v225_v0  ;;  %143 = vmatprep.mubr.msk.f32.mxu0 %vm226_vm0, %v225_v0  ;;  %v38_v3 = vld [vmem:[#allocation2] sm:$0xff]  ;;  %vm44_vm1 = vcmask 130048   ;;  %s227_s0 = smov [#allocation7]  }
  0x1c   :  { %140 = vmatpush3.msra.mxu0 %v43_v1  ;;  %153 = vtanh.f32 %v38_v3  ;;  %s125_s1 = sshll.u32 %s227_s0, 4  ;;  %s126_s1 = int_to_ptr.vmem [resolvable:$true] %s125_s1 }
  0x1d   :  { %141 = vmatprep.subr.mxu0 %v225_v0  ;;  %s195_s21 = scalar_lea.vmem %s126_s1, 128  ;;  %p200_p11 = scmp.lt.s32.totalorder %s126_s1, %s126_s1 }
  0x1e   :  { %142 = vmatpush3.msra.mxu0 %v42_v2  ;;  %p196_p10 = scmp.ne.s32.totalorder %s126_s1, %s195_s21  ;;  %p201_p12 = scmp.lt.s32.totalorder %s195_s21, %s195_s21 }
  0x20   :  { %p202_p13 = por %p201_p12, %p200_p11 }
  0x22   :  { %p203_p0 = pnand %p202_p13, %p196_p10 }
  0x29   :  { %v154_v4 = vpop.eup %153 }
  0x2a   :  { %v40_v5 = vmul.f32 0.4995, %v154_v4 }
  0x2c   :  { %v41_v6 = vadd.f32 0.5, %v40_v5 }
  0x2e   :  { %144 = vmatmul.mubr.msk.f32.vlgmr.msra.gmra.mxu0 %vm44_vm1, %v41_v6 }
  0xee   :  { %v114_v7 = vpop.f32.mrf.mxu0 }
  0xef   :  { %118 = vst [vmem:[#allocation7] sm:$0xff] %v114_v7 }
  0xf0   :  { %v145_v8 = vpop.f32.mrf.mxu0 }
  0xf1   :  { %206 = shalt.err (!%p203_p0)
}
  0xf2   :  { %128 = dma.vmem_to_hbm [thread:$0]  %s126_s1, 128, %s254_s2, [#allocation4]  }
  0xf3   :  { %219 = dma.done.wait [#allocation4], 128  }
  0xf4   :  { %220 = vsyncadd [#allocation4], 4294967168 }
  0xf5   :  { %132 = vsyncpa [#allocation3], 1 }
  0xf6   :  { %133 = vsyncpa [#allocation6], 1 }
  0xf7   :  { %134 = vsyncpa [#allocation4], 1 }

</bundles_post_ra>
